<compile_context>
chip_gen: v7x
topology: tpu7x:2x2x1
jax: 0.10.0
libtpu: 0.0.40
codegen_flags: <defaults>
</compile_context>

<pallas_src>
import jax
import jax.numpy as jnp
import numpy as np
from jax.experimental import pallas as pl
from jax.experimental.pallas import tpu as pltpu


TILE_N_TARGET = 512  # rows per grid step (multiple of 8).  At production
                     # SparseTSF shapes (L=720, D=30, plen=24) the two weight
                     # matrices (~2.6 MiB bf16), double-buffered row blocks and
                     # f32 intermediates stay ~10 MiB, well inside the scoped
                     # VMEM limit on every generation (v7x: 32 MiB scoped).


def _round_up(a, b):
    return (a + b - 1) // b * b


# ------------------------- Pallas kernel -------------------------

def sparsetsf_kernel(x_ref, m1_ref, b1_ref, m2_ref, b2_ref, o_ref):
    """One row block: x (tile_n, L) bf16 -> out (tile_n, pred_len) f32."""
    seq_len = x_ref.shape[1]

    # per-row sequence mean, removed here and re-added at the end (f32).
    xf = x_ref[...].astype(jnp.float32)                         # (tn, L)
    mean = jnp.sum(xf, axis=1, keepdims=True) * (1.0 / seq_len)
    xc = (xf - mean).astype(jnp.bfloat16)                       # (tn, L)

    # stage 1: conv1d("same") + residual + Linear(plen -> D) + bias, fused.
    z = jnp.dot(xc, m1_ref[...],
                preferred_element_type=jnp.float32) + b1_ref[...]   # (tn, segx*D)
    # TODO(synk): nn.Dropout is identity in eval mode; inference only.
    z = jnp.maximum(z, 0.0).astype(jnp.bfloat16)                # ReLU

    # stage 2: Linear(segx -> D, no bias) (x) Linear(D -> plen), fused.
    y = jnp.dot(z, m2_ref[...],
                preferred_element_type=jnp.float32)             # (tn, pred_len)

    o_ref[...] = y + b2_ref[...] + mean


# --------------------------- wrapper ---------------------------

def sparsetsf_forward(x, kparams, cfg):
    """x: (B, seq_len, enc_in) f32 -> (B, pred_len, enc_in) f32."""
    B, L, C = x.shape
    plen = cfg["period_len"]
    D = cfg["d_model"]
    pred_len = cfg["pred_len"]
    assert L == cfg["seq_len"] and C == cfg["enc_in"]
    assert L % plen == 0
    # the module's final reshape silently requires this:
    assert pred_len == D * plen, "pred_len must equal d_model * period_len"
    N = B * C

    m1, b1, m2, b2 = kparams
    K1 = m1.shape[1]                              # seg_num_x * d_model

    # (B, L, C) -> (N, L); bf16 halves the HBM read (matmul operands are bf16).
    x_t = jnp.transpose(x, (0, 2, 1)).reshape(N, L).astype(jnp.bfloat16)

    tile_n = min(TILE_N_TARGET, _round_up(N, 8))
    n_pad = _round_up(N, tile_n)
    if n_pad != N:
        x_t = jnp.concatenate(
            [x_t, jnp.zeros((n_pad - N, L), x_t.dtype)], axis=0)

    grid = (n_pad // tile_n,)
    flops = 2 * n_pad * (L * K1 + K1 * pred_len)
    bytes_accessed = (x_t.size * x_t.dtype.itemsize
                      + n_pad * pred_len * 4
                      + sum(int(np.prod(w.shape)) * w.dtype.itemsize
                            for w in kparams))

    out_flat = pl.pallas_call(
        sparsetsf_kernel,
        out_shape=jax.ShapeDtypeStruct((n_pad, pred_len), jnp.float32),
        grid=grid,
        in_specs=[
            pl.BlockSpec((tile_n, L), lambda i: (i, 0)),        # x rows (pipelined)
            pl.BlockSpec((L, K1), lambda i: (0, 0)),            # fused conv+embed (resident)
            pl.BlockSpec((1, K1), lambda i: (0, 0)),            # tiled patch-embed bias
            pl.BlockSpec((K1, pred_len), lambda i: (0, 0)),     # fused linear+predict (resident)
            pl.BlockSpec((1, pred_len), lambda i: (0, 0)),      # tiled predict bias
        ],
        out_specs=pl.BlockSpec((tile_n, pred_len), lambda i: (i, 0)),
        compiler_params=pltpu.CompilerParams(
            dimension_semantics=("parallel",)),                 # dual-TC on v7x
        cost_estimate=pl.CostEstimate(flops=flops, transcendentals=0,
                                      bytes_accessed=bytes_accessed),
    )(x_t, m1, b1, m2, b2)

    out = out_flat[:N].reshape(B, C, pred_len)
    return jnp.transpose(out, (0, 2, 1))


# -------------------- parameter / weight setup --------------------

def make_raw_params(key, cfg):
    """Raw PyTorch-shaped weights (deterministic)."""
    L = cfg["seq_len"]
    plen = cfg["period_len"]
    D = cfg["d_model"]
    segx = L // plen
    K = 1 + 2 * (plen // 2)
    ks = jax.random.split(key, 6)
    w_conv = jax.random.normal(ks[0], (K,), jnp.float32) * 0.2       # Conv1d(1,1,K), no bias
    w_pe = jax.random.normal(ks[1], (D, plen), jnp.float32) * 0.2    # Linear(plen, D).weight
    b_pe = jax.random.normal(ks[2], (D,), jnp.float32) * 0.1
    w_lin = jax.random.normal(ks[3], (D, segx), jnp.float32) * 0.2   # Linear(segx, D, bias=False)
    w_pred = jax.random.normal(ks[4], (plen, D), jnp.float32) * 0.2  # Linear(D, plen).weight
    b_pred = jax.random.normal(ks[5], (plen,), jnp.float32) * 0.1
    return (w_conv, w_pe, b_pe, w_lin, w_pred, b_pred)


def prepare_kernel_params(raw, cfg):
    """Fold the whole module (minus the ReLU) into two dense matrices."""
    w_conv, w_pe, b_pe, w_lin, w_pred, b_pred = raw
    L = cfg["seq_len"]
    plen = cfg["period_len"]
    D = cfg["d_model"]
    segx = L // plen
    K = w_conv.shape[0]
    P = plen // 2

    # conv1d ("same" zero padding, cross-correlation) as a Toeplitz matrix with
    # the residual connection folded in as "+ I":
    #   (conv(xc) + xc)[t] = sum_j xc[j] * (w[j - t + P] + [j == t])
    idx = jnp.arange(L)
    kk = idx[:, None] - idx[None, :] + P
    valid = (kk >= 0) & (kk < K)
    a = jnp.where(valid, w_conv[jnp.clip(kk, 0, K - 1)], 0.0)
    a = a + jnp.eye(L, dtype=jnp.float32)                        # (L, L)

    # Stage 1: (conv+res) -> reshape(segx, plen) -> Linear(plen -> D):
    #   M1[t, s*D + d] = sum_p A[t, s*plen + p] * w_pe[d, p]
    m1 = jnp.einsum("tsp,dp->tsd", a.reshape(L, segx, plen), w_pe)
    m1 = m1.reshape(L, segx * D)
    b1 = jnp.tile(b_pe, segx).reshape(1, segx * D)               # b1[s*D+d] = b_pe[d]

    # Stage 2: permute -> Linear(segx -> D, no bias) -> permute -> Linear(D -> plen):
    #   M2[s*D + d, e*plen + q] = w_lin[e, s] * w_pred[q, d]
    m2 = jnp.einsum("es,qd->sdeq", w_lin, w_pred).reshape(segx * D, D * plen)
    b2 = jnp.tile(b_pred, D).reshape(1, D * plen)                # b2[e*plen+q] = b_pred[q]

    return (m1.astype(jnp.bfloat16), b1.astype(jnp.float32),
            m2.astype(jnp.bfloat16), b2.astype(jnp.float32))


# ------------- pure-JAX reference (PyTorch semantics, f32) -------------

def reference_forward(x, raw, cfg):
    w_conv, w_pe, b_pe, w_lin, w_pred, b_pred = raw
    B, L, C = x.shape
    plen = cfg["period_len"]
    segx = L // plen
    K = w_conv.shape[0]
    P = plen // 2

    seq_mean = jnp.mean(x, axis=1, keepdims=True)             # (B,1,C)
    xc = jnp.transpose(x - seq_mean, (0, 2, 1))               # (B,C,L)
    xr = xc.reshape(-1, 1, L)
    conv = jax.lax.conv_general_dilated(
        xr, w_conv.reshape(1, 1, K), window_strides=(1,), padding=[(P, P)],
        dimension_numbers=("NCH", "OIH", "NCH"))
    x1 = conv.reshape(-1, C, L) + xc                          # (B,C,L)
    xp = x1.reshape(-1, segx, plen)                           # (B*C,segx,plen)
    z = jax.nn.relu(jnp.einsum("nsp,dp->nsd", xp, w_pe) + b_pe)
    zt = jnp.transpose(z, (0, 2, 1))                          # (N,D,segx)
    y1 = jnp.einsum("nds,es->nde", zt, w_lin)                 # (N,D,E)
    y1t = jnp.transpose(y1, (0, 2, 1))                        # (N,E,D)
    y2 = jnp.einsum("ned,pd->nep", y1t, w_pred) + b_pred      # (N,E,plen)
    y = y2.reshape(B, C, cfg["pred_len"])
    return jnp.transpose(y, (0, 2, 1)) + seq_mean             # (B,pred_len,C)


# ------------------------------- main -------------------------------

if __name__ == "__main__":
    # small config consistent with the module (pred_len == d_model * period_len)
    cfg = dict(seq_len=16, period_len=4, d_model=8, pred_len=32, enc_in=4,
               dropout=0.1)
    B = 2

    key = jax.random.PRNGKey(0)
    kx, kp = jax.random.split(key)
    x = jax.random.normal(kx, (B, cfg["seq_len"], cfg["enc_in"]), jnp.float32)

    raw = make_raw_params(kp, cfg)
    kparams = prepare_kernel_params(raw, cfg)

    out = sparsetsf_forward(x, kparams, cfg)
    out = jax.block_until_ready(out)

    ref = jax.block_until_ready(reference_forward(x, raw, cfg))
    # bf16 matmul path -> relaxed tolerance (mean / bias / accum kept in f32)
    np.testing.assert_allclose(np.asarray(out), np.asarray(ref),
                               rtol=2e-2, atol=2e-2)
    assert out.shape == (B, cfg["pred_len"], cfg["enc_in"])
    print("KERNEL_OK")
</pallas_src>

<mosaic_0001>
module attributes {stable_mosaic.version = 11 : i64} {
  func.func @sparsetsf_kernel(%arg0: i32, %arg1: memref<8x16xbf16, #tpu.memory_space<vmem>>, %arg2: memref<16x32xbf16, #tpu.memory_space<vmem>>, %arg3: memref<1x32xf32, #tpu.memory_space<vmem>>, %arg4: memref<32x32xbf16, #tpu.memory_space<vmem>>, %arg5: memref<1x32xf32, #tpu.memory_space<vmem>>, %arg6: memref<8x32xf32, #tpu.memory_space<vmem>>) attributes {dimension_semantics = [#tpu.dimension_semantics<parallel>], iteration_bounds = array<i64: 1>, scalar_prefetch = 0 : i64, scratch_operands = 0 : i64, tpu.core_type = #tpu.core_type<tc>, window_params = [{transform_indices = @transform_0, window_bounds = array<i64: 8, 16>}, {pipeline_mode = #tpu.pipeline_mode<synchronous>, transform_indices = @transform_1, window_bounds = array<i64: 16, 32>}, {pipeline_mode = #tpu.pipeline_mode<synchronous>, transform_indices = @transform_2, window_bounds = array<i64: 1, 32>}, {pipeline_mode = #tpu.pipeline_mode<synchronous>, transform_indices = @transform_3, window_bounds = array<i64: 32, 32>}, {pipeline_mode = #tpu.pipeline_mode<synchronous>, transform_indices = @transform_4, window_bounds = array<i64: 1, 32>}, {transform_indices = @transform_5, window_bounds = array<i64: 8, 32>}]} {
    %c0 = arith.constant 0 : index
    %c0_0 = arith.constant 0 : index
    %0 = vector.load %arg1[%c0, %c0_0] : memref<8x16xbf16, #tpu.memory_space<vmem>>, vector<8x16xbf16>
    %1 = arith.extf %0 : vector<8x16xbf16> to vector<8x16xf32>
    %cst = arith.constant dense<0.000000e+00> : vector<8xf32>
    %2 = vector.multi_reduction <add>, %1, %cst [1] : vector<8x16xf32> to vector<8xf32>
    %3 = vector.shape_cast %2 : vector<8xf32> to vector<8x1xf32>
    %cst_1 = arith.constant 6.250000e-02 : f32
    %4 = vector.broadcast %cst_1 : f32 to vector<8x1xf32>
    %5 = arith.mulf %3, %4 : vector<8x1xf32>
    %6 = vector.broadcast %5 : vector<8x1xf32> to vector<8x16xf32>
    %7 = arith.subf %1, %6 : vector<8x16xf32>
    %8 = arith.truncf %7 : vector<8x16xf32> to vector<8x16xbf16>
    %c0_2 = arith.constant 0 : index
    %c0_3 = arith.constant 0 : index
    %9 = vector.load %arg2[%c0_2, %c0_3] : memref<16x32xbf16, #tpu.memory_space<vmem>>, vector<16x32xbf16>
    %cst_4 = arith.constant dense<0.000000e+00> : vector<8x32xf32>
    %10 = tpu.matmul %8, %9, %cst_4 {dimension_numbers = #tpu.dot_dimension_numbers<[1], [0], [0], [1], [0, 0, 1, 1], [], []>} : vector<8x16xbf16>, vector<16x32xbf16>, vector<8x32xf32> -> vector<8x32xf32>
    %c0_5 = arith.constant 0 : index
    %c0_6 = arith.constant 0 : index
    %11 = vector.load %arg3[%c0_5, %c0_6] : memref<1x32xf32, #tpu.memory_space<vmem>>, vector<1x32xf32>
    %12 = vector.broadcast %11 : vector<1x32xf32> to vector<8x32xf32>
    %13 = arith.addf %10, %12 : vector<8x32xf32>
    %cst_7 = arith.constant 0.000000e+00 : f32
    %14 = vector.broadcast %cst_7 : f32 to vector<8x32xf32>
    %15 = arith.maximumf %13, %14 : vector<8x32xf32>
    %16 = arith.truncf %15 : vector<8x32xf32> to vector<8x32xbf16>
    %c0_8 = arith.constant 0 : index
    %c0_9 = arith.constant 0 : index
    %17 = vector.load %arg4[%c0_8, %c0_9] : memref<32x32xbf16, #tpu.memory_space<vmem>>, vector<32x32xbf16>
    %cst_10 = arith.constant dense<0.000000e+00> : vector<8x32xf32>
    %18 = tpu.matmul %16, %17, %cst_10 {dimension_numbers = #tpu.dot_dimension_numbers<[1], [0], [0], [1], [0, 0, 1, 1], [], []>} : vector<8x32xbf16>, vector<32x32xbf16>, vector<8x32xf32> -> vector<8x32xf32>
    %c0_11 = arith.constant 0 : index
    %c0_12 = arith.constant 0 : index
    %19 = vector.load %arg5[%c0_11, %c0_12] : memref<1x32xf32, #tpu.memory_space<vmem>>, vector<1x32xf32>
    %20 = vector.broadcast %19 : vector<1x32xf32> to vector<8x32xf32>
    %21 = arith.addf %18, %20 : vector<8x32xf32>
    %22 = vector.broadcast %5 : vector<8x1xf32> to vector<8x32xf32>
    %23 = arith.addf %21, %22 : vector<8x32xf32>
    %c0_13 = arith.constant 0 : index
    %c0_14 = arith.constant 0 : index
    %24 = vector.load %arg6[%c0_13, %c0_14] : memref<8x32xf32, #tpu.memory_space<vmem>>, vector<8x32xf32>
    tpu.vector_store %arg6[%c0_13, %c0_14], %23 {strides = array<i32>} : memref<8x32xf32, #tpu.memory_space<vmem>>, vector<8x32xf32>,
    return
  }
  func.func @transform_0(%arg0: i32) -> (i32, i32) {
    %c0_i32 = arith.constant 0 : i32
    %c0_i32_0 = arith.constant 0 : i32
    return %arg0, %c0_i32 : i32, i32
  }
  func.func @transform_1(%arg0: i32) -> (i32, i32) {
    %c0_i32 = arith.constant 0 : i32
    %c0_i32_0 = arith.constant 0 : i32
    %c0_i32_1 = arith.constant 0 : i32
    return %c0_i32, %c0_i32_0 : i32, i32
  }
  func.func @transform_2(%arg0: i32) -> (i32, i32) {
    %c0_i32 = arith.constant 0 : i32
    %c0_i32_0 = arith.constant 0 : i32
    %c0_i32_1 = arith.constant 0 : i32
    return %c0_i32, %c0_i32_0 : i32, i32
  }
  func.func @transform_3(%arg0: i32) -> (i32, i32) {
    %c0_i32 = arith.constant 0 : i32
    %c0_i32_0 = arith.constant 0 : i32
    %c0_i32_1 = arith.constant 0 : i32
    return %c0_i32, %c0_i32_0 : i32, i32
  }
  func.func @transform_4(%arg0: i32) -> (i32, i32) {
    %c0_i32 = arith.constant 0 : i32
    %c0_i32_0 = arith.constant 0 : i32
    %c0_i32_1 = arith.constant 0 : i32
    return %c0_i32, %c0_i32_0 : i32, i32
  }
  func.func @transform_5(%arg0: i32) -> (i32, i32) {
    %c0_i32 = arith.constant 0 : i32
    %c0_i32_0 = arith.constant 0 : i32
    return %arg0, %c0_i32 : i32, i32
  }
}

</mosaic_0001>

<bundles_post_ra>
// kernel: tpu_custom_call.1
= control target key start
LH: loop header
LB: loop body
LE: loop exit
PB: predicated region body
PF: predicated region fallthrough
CT: control target
= control target key end

     0   :  { %10 = vsyncpa [#allocation3], 0  ;;  %s446_s0 = inlined_call_operand.hbm [shape: bf16[8,16], index: 0, kind: input, shape index: {}]   ;;  %s447_s1 = inlined_call_operand.hbm [shape: bf16[16,32], index: 1, kind: input, shape index: {}]   ;;  %s448_s2 = inlined_call_operand.vmem [shape: f32[1,32], index: 2, kind: input, shape index: {}]   ;;  %s449_s3 = inlined_call_operand.hbm [shape: bf16[32,32], index: 3, kind: input, shape index: {}]   ;;  %s450_s4 = inlined_call_operand.vmem [shape: f32[1,32], index: 4, kind: input, shape index: {}]   ;;  %s451_s5 = inlined_call_operand.hbm [shape: f32[8,32], index: 5, kind: output, shape index: {}]  }
   0x1   :  { %11 = vsyncpa [#allocation6], 0 }
   0x2   :  { %12 = vsyncpa [#allocation4], 0  ;;  %s346_s18 = smov [#allocation5]   ;;  %s252_s22 = scalar_lea.hbm %s447_s1, 128 }
   0x3   :  { %s28_s19 = sshll.u32 %s346_s18, 4  ;;  %p253_p0 = scmp.ne.s32.totalorder %s447_s1, %s252_s22  ;;  %s29_s19 = int_to_ptr.vmem [resolvable:$true] %s28_s19 }
   0x4   :  { %p256_p1 = scmp.lt.u32.totalorder %s252_s22, %s447_s1 }
   0x6   :  { %p258_p2 = pnand %p256_p1, %p253_p0 }
   0x8   :  { %261 = shalt.err (!%p258_p2)
}
   0x9   :  { %s262_s27 = scalar_lea.vmem %s29_s19, 128  ;;  %p267_p4 = scmp.lt.s32.totalorder %s29_s19, %s29_s19 }
   0xa   :  { %p263_p3 = scmp.ne.s32.totalorder %s29_s19, %s262_s27  ;;  %p268_p5 = scmp.lt.s32.totalorder %s262_s27, %s262_s27 }
   0xc   :  { %p269_p6 = por %p268_p5, %p267_p4 }
   0xe   :  { %p270_p7 = pnand %p269_p6, %p263_p3 }
  0x10   :  { %273 = shalt.err (!%p270_p7)
}
  0x11   :  { %s347_s28 = smov 64   ;;  %s348_s29 = smov 4  }
  0x12   :  { %34 = dma.hbm_to_vmem [thread:$0]  %s447_s1, 128, %s29_s19, [#allocation6], %s347_s28, %s347_s28, %s348_s29  }
  0x13   :  { %s349_s7 = smov [#allocation2]   ;;  %s350_s9 = smov [#allocation7]  }
  0x14   :  { %s19_s8 = sshll.u32 %s349_s7, 4  ;;  %s42_s10 = sshll.u32 %s350_s9, 4  ;;  %s20_s8 = int_to_ptr.vmem [resolvable:$true] %s19_s8  ;;  %s43_s10 = int_to_ptr.vmem [resolvable:$true] %s42_s10 }
  0x15   :  { %s274_s13 = scalar_lea.hbm %s446_s0, 64 }
  0x16   :  { %p275_p8 = scmp.ne.s32.totalorder %s446_s0, %s274_s13  ;;  %p278_p9 = scmp.lt.u32.totalorder %s274_s13, %s446_s0 }
  0x18   :  { %p280_p10 = pnand %p278_p9, %p275_p8 }
  0x1a   :  { %283 = shalt.err (!%p280_p10)
}
  0x1b   :  { %s284_s1 = scalar_lea.vmem %s20_s8, 64  ;;  %p289_p12 = scmp.lt.s32.totalorder %s20_s8, %s20_s8 }
  0x1c   :  { %p285_p11 = scmp.ne.s32.totalorder %s20_s8, %s284_s1  ;;  %p290_p13 = scmp.lt.s32.totalorder %s284_s1, %s284_s1 }
  0x1e   :  { %p291_p0 = por %p290_p13, %p289_p12 }
  0x20   :  { %p292_p1 = pnand %p291_p0, %p285_p11 }
  0x22   :  { %295 = shalt.err (!%p292_p1)
}
  0x23   :  { %22 = dma.hbm_to_vmem [thread:$0]  %s446_s0, 64, %s20_s8, [#allocation3]  }
  0x24   :  { %s296_s22 = scalar_lea.hbm %s449_s3, 256 }
  0x25   :  { %p297_p2 = scmp.ne.s32.totalorder %s449_s3, %s296_s22  ;;  %p300_p3 = scmp.lt.u32.totalorder %s296_s22, %s449_s3 }
  0x27   :  { %p302_p4 = pnand %p300_p3, %p297_p2 }
  0x29   :  { %305 = shalt.err (!%p302_p4)
}
  0x2a   :  { %s306_s27 = scalar_lea.vmem %s43_s10, 256  ;;  %p311_p6 = scmp.lt.s32.totalorder %s43_s10, %s43_s10 }
  0x2b   :  { %p307_p5 = scmp.ne.s32.totalorder %s43_s10, %s306_s27  ;;  %p312_p7 = scmp.lt.s32.totalorder %s306_s27, %s306_s27 }
  0x2d   :  { %p313_p8 = por %p312_p7, %p311_p6 }
  0x2f   :  { %p314_p9 = pnand %p313_p8, %p307_p5 }
  0x31   :  { %317 = shalt.err (!%p314_p9)
}
  0x32   :  { %48 = dma.hbm_to_vmem [thread:$0]  %s449_s3, 256, %s43_s10, [#allocation6], %s347_s28, %s347_s28, %s348_s29  }
  0x33   :  { %340 = dma.done.wait [#allocation3], 64  }
  0x34   :  { %341 = vsyncadd [#allocation3], 4294967232 }
  0x35   :  { %342 = dma.done.wait [#allocation6], 384  }
  0x36   :  { %343 = vsyncadd [#allocation6], 4294966912  ;;  %vm63_vm0 = vcmask 130048   ;;  %v61_v0 = vld [vmem:[#allocation2] sm:$0xf]  ;;  %v249_v3 = vld [vmem:[#allocation5] sm:$0xff]  }
  0x37   :  { %v62_v1 = vunpack.c.l.bf16 %v61_v0  ;;  %v351_v4 = vmov 0.0   ;;  %vm352_vm1 = vmmov 0   ;;  %v250_v9 = vld [vmem:[#allocation7] sm:$0xff]   ;;  %v251_v10 = vld [vmem:[#allocation7 + $0x8] sm:$0xff]   ;;  %v215_v11 = vld [vmem:[%s448_s2] ss:$0 sm:$0xff] }
  0x38   :  { %227 = vmatprep.subr.bf16.mxu0 %v351_v4  ;;  %233 = vmatprep.subr.bf16.mxu1 %v351_v4  ;;  %vm153_vm2 = vcmask 261120   ;;  %v218_v19 = vld [vmem:[%s450_s4] ss:$0 sm:$0xff]  ;;  %s353_s7 = smov [#allocation8]  }
  0x39   :  { %v64_v2 = vsel %vm63_vm0, %v62_v1, 0.0  ;;  %228 = vmatpush3.bf16.msra.mxu0 %v249_v3  ;;  %229 = vmatprep.mubr.msk.bf16.mxu0 %vm352_vm1, %v351_v4  ;;  %s205_s8 = sshll.u32 %s353_s7, 4  ;;  %s206_s8 = int_to_ptr.vmem [resolvable:$true] %s205_s8 }
  0x3a   :  { %65 = vadd.xlane.f32.xlu0 %v64_v2  ;;  %237 = vmatprep.mubr.msk.bf16.mxu1 %vm352_vm1, %v351_v4  ;;  %s318_s2 = scalar_lea.vmem %s206_s8, 128  ;;  %p323_p11 = scmp.lt.s32.totalorder %s206_s8, %s206_s8 }
  0x3b   :  { %234 = vmatpush3.bf16.msra.mxu1 %v250_v9  ;;  %p319_p10 = scmp.ne.s32.totalorder %s206_s8, %s318_s2  ;;  %p324_p12 = scmp.lt.s32.totalorder %s318_s2, %s318_s2 }
  0x3c   :  { %235 = vmatprep.subr.bf16.mxu1 %v351_v4 }
  0x3d   :  { %p325_p13 = por %p324_p12, %p323_p11 }
  0x3f   :  { %236 = vmatpush3.bf16.msra.mxu1 %v251_v10  ;;  %p326_p0 = pnand %p325_p13, %p319_p10 }
  0xc7   :  { %v66_v5 = vpop.xlane.xlu0 %65 }
  0xc8   :  { %v67_v6 = vmul.f32 0.0625, %v66_v5 }
  0xca   :  { %v68_v7 = vsub.f32 %v62_v1, %v67_v6 }
  0xcc   :  { %v69_v8 = vpack.c.bf16 %v68_v7, %v68_v7 }
  0xce   :  { %230 = vmatmul.mubr.msk.bf16.vlgmr.msra.gmra.mrb[0].mxu0 %vm63_vm0, %v69_v8 }
 0x1a1   :  { %v122_v12 = vpop.f32.mrb[0].mxu0 }
 0x1a2   :  { %v123_v13 = vadd.f32 %v215_v11, %v122_v12  ;;  %v231_v14 = vpop.f32.mrb[1].mxu0 }
 0x1a3   :  { %v125_v15 = vpop.f32.mrb[2].mxu0 }
 0x1a4   :  { %v128_v16 = vmax.f32 %v123_v13, 0.0  ;;  %v232_v17 = vpop.f32.mrb[3].mxu0 }
 0x1a6   :  { %v129_v18 = vpack.c.bf16 %v128_v16, %v128_v16 }
 0x1a8   :  { %238 = vmatmul.mubr.msk.bf16.vlgmr.msra.gmra.mrb[0].mxu1 %vm153_vm2, %v129_v18 }
 0x27b   :  { %v191_v20 = vpop.f32.mrb[0].mxu1 }
 0x27c   :  { %v192_v21 = vadd.f32 %v218_v19, %v191_v20  ;;  %v239_v22 = vpop.f32.mrb[1].mxu1 }
 0x27d   :  { %v194_v23 = vpop.f32.mrb[2].mxu1 }
 0x27e   :  { %v197_v24 = vadd.f32 %v192_v21, %v67_v6  ;;  %v240_v25 = vpop.f32.mrb[3].mxu1 }
 0x280   :  { %198 = vst.msk [vmem:[#allocation8] sm:$0xff] %vm153_vm2, %v197_v24 }
 0x281   :  { %329 = shalt.err (!%p326_p0)
}
 0x282   :  { %s330_s4 = scalar_lea.hbm %s451_s5, 128 }
 0x283   :  { %p331_p1 = scmp.ne.s32.totalorder %s451_s5, %s330_s4  ;;  %p334_p2 = scmp.lt.u32.totalorder %s330_s4, %s451_s5 }
 0x285   :  { %p336_p3 = pnand %p334_p2, %p331_p1 }
 0x287   :  { %339 = shalt.err (!%p336_p3)
}
 0x288   :  { %208 = dma.vmem_to_hbm [thread:$0]  %s206_s8, 128, %s451_s5, [#allocation4]  }
 0x289   :  { %344 = dma.done.wait [#allocation4], 128  }
 0x28a   :  { %345 = vsyncadd [#allocation4], 4294967168 }
 0x28b   :  { %212 = vsyncpa [#allocation3], 1 }
 0x28c   :  { %213 = vsyncpa [#allocation6], 1 }
 0x28d   :  { %214 = vsyncpa [#allocation4], 1 }

</bundles_post_ra>
